<compile_context>
chip_gen: v7x
topology: tpu7x:2x2x1
jax: 0.10.0
libtpu: 0.0.40
codegen_flags: <defaults>
</compile_context>

<pallas_src>
import math
import jax
import jax.numpy as jnp
from jax.experimental import pallas as pl
from jax.experimental.pallas import tpu as pltpu


_VMEM_LIMIT = 32 * 1024 * 1024   # safe on v5e / v6e / v7x


def _round_up(x, m):
    return ((x + m - 1) // m) * m


def _pick_row_tile(fr, max_tile=512):
    """Largest 8-aligned divisor of fr that is <= max_tile (or fr itself)."""
    if fr <= max_tile:
        return fr
    for t in range(max_tile, 7, -8):
        if fr % t == 0 and t % 8 == 0:
            return t
    return fr   # fall back: one (large) tile per image


# ----------------------------------------------------------------------------
# Kernel 1: input_proj (1x1 conv) fused with the per-image spatial mean.
# Row-tiled reduction; projection applied once per image at the last tile.
# ----------------------------------------------------------------------------
def _make_pooled_proj_kernel(rows_per_image):
    inv_rows = 1.0 / float(rows_per_image)

    def kernel(x_ref, w_ref, b_ref, pooled_ref, acc_ref):
        r = pl.program_id(1)

        @pl.when(r == 0)
        def _():
            acc_ref[...] = jnp.zeros_like(acc_ref)

        # Partial (lane-folded) sum over this row tile.
        acc_ref[...] += jnp.sum(x_ref[...], axis=0, keepdims=True)

        @pl.when(r == pl.num_programs(1) - 1)
        def _():
            mean_x = acc_ref[...] * inv_rows                     # [1, lane]
            pooled = (jnp.dot(mean_x, w_ref[...],
                              preferred_element_type=jnp.float32)
                      + b_ref[...])                              # [1, Dp]
            pooled_ref[...] = pooled[None, :, :]                 # [1, 1, Dp]

    return kernel


def pooled_input_proj_pallas(src_nhwc, w, b, *, max_row_tile=512):
    """Returns mean_{H,W}(input_proj(src)) per image: [B, D] (f32)."""
    B, H, W, C = src_nhwc.shape
    D = w.shape[1]
    Dp = _round_up(D, 128)                    # lane-dense pooled output
    LANE = 128
    rows_per_image = H * W

    if C < LANE and LANE % C == 0 and (rows_per_image * C) % LANE == 0:
        # Tiny-C path: fold 128//C pixels per vreg row -> full-lane loads.
        fold = LANE // C
        lane = LANE
        fr = rows_per_image * C // LANE       # folded rows per image
    else:
        fold = 1
        lane = C
        fr = rows_per_image

    xv = src_nhwc.reshape(B * fr, lane)       # free reshape (contiguous view)
    tile_r = _pick_row_tile(fr, max_row_tile)
    n_tiles = fr // tile_r
    assert tile_r % 8 == 0 or (B == 1 and n_tiles == 1), (
        "per-image (folded) row count must be 8-aligned for batched grids")

    # Pad W to lane-dense Dp and pre-expand so row (pix*C + c) maps to W[c]:
    # the pooled projection then needs no in-kernel reshape of the folded acc.
    w_pad = jnp.zeros((C, Dp), jnp.float32).at[:, :D].set(w.astype(jnp.float32))
    w_k = jnp.tile(w_pad, (fold, 1)) if fold > 1 else w_pad        # [lane, Dp]
    b_pad = jnp.zeros((1, Dp), jnp.float32).at[:, :D].set(b.astype(jnp.float32))

    kernel = _make_pooled_proj_kernel(rows_per_image)

    pooled = pl.pallas_call(
        kernel,
        out_shape=jax.ShapeDtypeStruct((B, 1, Dp), jnp.float32),
        grid_spec=pltpu.PrefetchScalarGridSpec(
            num_scalar_prefetch=0,
            grid=(B, n_tiles),
            in_specs=[
                pl.BlockSpec((tile_r, lane),
                             lambda bi, r: (bi * n_tiles + r, 0)),
                pl.BlockSpec(w_k.shape, lambda bi, r: (0, 0)),
                pl.BlockSpec((1, Dp), lambda bi, r: (0, 0)),
            ],
            out_specs=pl.BlockSpec((1, 1, Dp), lambda bi, r: (bi, 0, 0)),
            scratch_shapes=[pltpu.VMEM((1, lane), jnp.float32)],
        ),
        compiler_params=pltpu.CompilerParams(
            dimension_semantics=("parallel", "arbitrary"),
            vmem_limit_bytes=_VMEM_LIMIT),
    )(xv, w_k, b_pad)
    return pooled.reshape(B, Dp)[:, :D]


# ----------------------------------------------------------------------------
# Kernel 2: fused prediction heads over hs [N, D], row-tiled, with packed
# bf16 weights and a single lane-dense [tile, 128] output per step:
#   cols [0:n_cls]            obj_class logits
#   cols [n_cls:n_cls+4]      obj box (sigmoid)
#   cols [n_cls+4:n_cls+8]    sub box (sigmoid)
#   cols [n_cls+8:n_cls+10]   binary logits
#   remaining cols            zero padding (unmasked full-lane stores)
# ----------------------------------------------------------------------------
def _heads_kernel(hs_ref, w1_ref, b1_ref, w2o_ref, b2o_ref, w2s_ref, b2s_ref,
                  wf_ref, bf_ref, mask_ref, out_ref):
    f32, bf16 = jnp.float32, jnp.bfloat16
    xb = hs_ref[...]                                   # [tile, D] bf16
    D = xb.shape[1]

    # obj|sub MLP layer 1: concatenated weights -> one [tile,D]x[D,2D] matmul.
    h1 = jnp.maximum(
        jnp.dot(xb, w1_ref[...], preferred_element_type=f32) + b1_ref[...],
        0.0)
    h1b = h1.astype(bf16)

    # Layer 2: block-diagonal split into two dense [D,D] matmuls (no zero
    # blocks on the MXU).
    h2o = jnp.maximum(
        jnp.dot(h1b[:, :D], w2o_ref[...], preferred_element_type=f32)
        + b2o_ref[...], 0.0)
    h2s = jnp.maximum(
        jnp.dot(h1b[:, D:], w2s_ref[...], preferred_element_type=f32)
        + b2s_ref[...], 0.0)

    # All final projections fused into one [tile,3D]x[3D,P] matmul.
    cat = jnp.concatenate([xb, h2o.astype(bf16), h2s.astype(bf16)], axis=1)
    z = jnp.dot(cat, wf_ref[...], preferred_element_type=f32) + bf_ref[...]

    out_ref[...] = jnp.where(mask_ref[...] > 0.5, jax.nn.sigmoid(z), z)


def pack_head_params(p):
    """Pre-pack head weights host-side ONCE (bf16 weights, f32 biases)."""
    f32, bf16 = jnp.float32, jnp.bfloat16
    D = p["obj_w1"].shape[0]
    n_cls = p["cls_w"].shape[1]
    n_bin = p["bin_w"].shape[1]
    n_out = n_cls + 4 + 4 + n_bin
    P = max(128, _round_up(n_out, 128))      # lane-dense output width

    w1 = jnp.concatenate([p["obj_w1"], p["sub_w1"]], axis=1)        # [D, 2D]
    b1 = jnp.concatenate([p["obj_b1"], p["sub_b1"]], axis=1)        # [1, 2D]

    wf = jnp.zeros((3 * D, P), f32)                                  # [3D, P]
    wf = wf.at[:D, :n_cls].set(p["cls_w"])
    wf = wf.at[:D, n_cls + 8:n_cls + 8 + n_bin].set(p["bin_w"])
    wf = wf.at[D:2 * D, n_cls:n_cls + 4].set(p["obj_w3"])
    wf = wf.at[2 * D:, n_cls + 4:n_cls + 8].set(p["sub_w3"])
    bf = jnp.zeros((1, P), f32)
    bf = bf.at[:, :n_cls].set(p["cls_b"])
    bf = bf.at[:, n_cls:n_cls + 4].set(p["obj_b3"])
    bf = bf.at[:, n_cls + 4:n_cls + 8].set(p["sub_b3"])
    bf = bf.at[:, n_cls + 8:n_cls + 8 + n_bin].set(p["bin_b"])

    box_mask = jnp.zeros((1, P), f32).at[:, n_cls:n_cls + 8].set(1.0)

    return {
        "w1": w1.astype(bf16), "b1": b1.astype(f32),
        "w2o": p["obj_w2"].astype(bf16), "b2o": p["obj_b2"].astype(f32),
        "w2s": p["sub_w2"].astype(bf16), "b2s": p["sub_b2"].astype(f32),
        "wf": wf.astype(bf16), "bf": bf,
        "box_mask": box_mask,
        "n_cls": n_cls, "n_bin": n_bin, "P": P,
    }


def heads_pallas(hs_bf16, packed, *, tile_m=512):
    N, D = hs_bf16.shape
    P = packed["wf"].shape[1]
    tile_m = min(tile_m, _round_up(N, 8))
    n_pad = _round_up(N, tile_m)
    if n_pad != N:
        hs_bf16 = jnp.pad(hs_bf16, ((0, n_pad - N), (0, 0)))
    n_tiles = n_pad // tile_m

    weights = [packed["w1"], packed["b1"], packed["w2o"], packed["b2o"],
               packed["w2s"], packed["b2s"], packed["wf"], packed["bf"],
               packed["box_mask"]]

    def const_spec(arr):
        # Constant block index across the grid -> stays VMEM-resident, no
        # re-DMA between row tiles.
        return pl.BlockSpec(arr.shape, lambda i: (0, 0))

    out = pl.pallas_call(
        _heads_kernel,
        out_shape=jax.ShapeDtypeStruct((n_pad, P), jnp.float32),
        grid_spec=pltpu.PrefetchScalarGridSpec(
            num_scalar_prefetch=0,
            grid=(n_tiles,),
            in_specs=[pl.BlockSpec((tile_m, D), lambda i: (i, 0))]
                     + [const_spec(w) for w in weights],
            out_specs=pl.BlockSpec((tile_m, P), lambda i: (i, 0)),
        ),
        compiler_params=pltpu.CompilerParams(
            dimension_semantics=("parallel",),        # 2x on v7x's two TCs
            vmem_limit_bytes=_VMEM_LIMIT),
    )(hs_bf16, *weights)
    return out[:N]


# ----------------------------------------------------------------------------
# Plain-JAX glue: box conversion + get_mask_from_query (elementwise/broadcast).
# Matches the PyTorch reference: x2/y2 are clamped, x1/y1 are not.
# ----------------------------------------------------------------------------
def box_cxcywh_to_xyxy(b):
    cx, cy, w, h = b[..., 0], b[..., 1], b[..., 2], b[..., 3]
    return jnp.stack([cx - 0.5 * w, cy - 0.5 * h, cx + 0.5 * w, cy + 0.5 * h], -1)


def get_mask_from_query(coords, img_size, mask_shape):
    # coords: [B, Q, 4] (cxcywh, sigmoid range), img_size: [B, 2] = (H_img, W_img)
    Hm, Wm = mask_shape[1], mask_shape[2]
    xyxy = box_cxcywh_to_xyxy(coords)
    w_sc = img_size[:, 1][:, None]
    h_sc = img_size[:, 0][:, None]
    x1 = jnp.floor(xyxy[..., 0] * w_sc / 32.0).astype(jnp.int32)
    y1 = jnp.floor(xyxy[..., 1] * h_sc / 32.0).astype(jnp.int32)
    x2 = jnp.floor(xyxy[..., 2] * w_sc / 32.0).astype(jnp.int32)
    y2 = jnp.floor(xyxy[..., 3] * h_sc / 32.0).astype(jnp.int32)
    x2 = jnp.minimum(x2, Wm - 1)
    y2 = jnp.minimum(y2, Hm - 1)
    rows = jnp.arange(Hm)[None, None, :, None]
    cols = jnp.arange(Wm)[None, None, None, :]
    mask = (
        (rows < y1[:, :, None, None])
        | (rows > y2[:, :, None, None])
        | (cols < x1[:, :, None, None])
        | (cols > x2[:, :, None, None])
    )
    return mask  # [B, Q, Hm, Wm] bool


# ----------------------------------------------------------------------------
# Parameter init (deterministic, PyTorch-Linear-style uniform bounds).
# ----------------------------------------------------------------------------
def linear_params(key, fan_in, fan_out):
    k1, k2 = jax.random.split(key)
    bound = 1.0 / math.sqrt(fan_in)
    w = jax.random.uniform(k1, (fan_in, fan_out), jnp.float32, -bound, bound)
    b = jax.random.uniform(k2, (1, fan_out), jnp.float32, -bound, bound)
    return w, b


def init_params(key, c_in, hidden_dim, num_obj_classes, num_queries):
    keys = jax.random.split(key, 12)
    p = {}
    p["proj_w"], p["proj_b"] = linear_params(keys[0], c_in, hidden_dim)
    p["cls_w"], p["cls_b"] = linear_params(keys[1], hidden_dim, num_obj_classes + 1)
    p["obj_w1"], p["obj_b1"] = linear_params(keys[2], hidden_dim, hidden_dim)
    p["obj_w2"], p["obj_b2"] = linear_params(keys[3], hidden_dim, hidden_dim)
    p["obj_w3"], p["obj_b3"] = linear_params(keys[4], hidden_dim, 4)
    p["sub_w1"], p["sub_b1"] = linear_params(keys[5], hidden_dim, hidden_dim)
    p["sub_w2"], p["sub_b2"] = linear_params(keys[6], hidden_dim, hidden_dim)
    p["sub_w3"], p["sub_b3"] = linear_params(keys[7], hidden_dim, 4)
    p["bin_w"], p["bin_b"] = linear_params(keys[8], hidden_dim, 2)
    p["query_embed"] = jax.random.normal(keys[9], (num_queries, hidden_dim), jnp.float32)
    return p


# ----------------------------------------------------------------------------
# Forward (mirrors DETR_PartMap.forward with binary=True, aux_loss=False).
# `packed_heads` is pack_head_params(params), computed ONCE at init time.
# ----------------------------------------------------------------------------
def detr_partmap_forward(params, packed_heads, src_nhwc, mask, img_size,
                         num_verb_classes=5, num_dec_layers=6):
    B, H, W, C = src_nhwc.shape
    D = params["proj_w"].shape[1]
    Q = params["query_embed"].shape[0]
    L = num_dec_layers

    # ----- input_proj (1x1 conv) fused with the per-image spatial mean ------
    # TODO(synk): a real transformer encoder would consume the full projected
    # feature map; it is intentionally not materialized here (dead HBM write).
    pooled = pooled_input_proj_pallas(src_nhwc, params["proj_w"],
                                      params["proj_b"])            # [B, D]

    # ----- transformer.forward_box -----------------------------------------
    # TODO(synk): backbone + transformer encoder/decoder are external submodules;
    # stubbed with a deterministic pooled-query mix producing hs_box [L,B,Q,D].
    scales = (jnp.arange(1, L + 1, dtype=jnp.float32) / L)[:, None, None, None]
    hs_box = jnp.tanh(
        scales * (pooled[None, :, None, :] + params["query_embed"][None, None, :, :])
    )                                                               # [L,B,Q,D]

    # ----- prediction heads: fused, row-tiled Pallas kernel ------------------
    n_cls, n_bin = packed_heads["n_cls"], packed_heads["n_bin"]
    hs_flat = hs_box.reshape(L * B * Q, D).astype(jnp.bfloat16)
    heads_out = heads_pallas(hs_flat, packed_heads)                 # [L*B*Q, 128]
    outputs_obj_class = heads_out[:, :n_cls].reshape(L, B, Q, n_cls)
    outputs_obj_coord = heads_out[:, n_cls:n_cls + 4].reshape(L, B, Q, 4)
    outputs_sub_coord = heads_out[:, n_cls + 4:n_cls + 8].reshape(L, B, Q, 4)
    pred_binary_logits = heads_out[:, n_cls + 8:n_cls + 8 + n_bin].reshape(L, B, Q, n_bin)

    # ----- get_mask_from_query ----------------------------------------------
    mask_object = get_mask_from_query(outputs_obj_coord[-1], img_size, mask.shape)
    mask_human = get_mask_from_query(outputs_sub_coord[-1], img_size, mask.shape)

    # ----- binary branch -----------------------------------------------------
    # TODO(synk): transformer.forward_binary is external; util_value /
    # binary_decoder_weight stubbed as zeros, hs_binary == hs_box.
    pred_part_binary = jnp.zeros((B, Q, 6, 2), jnp.float32)
    binary_decoder_weight = jnp.zeros((B, Q, H * W), jnp.float32)

    # 'verb_labels' not in losses -> zeros, matching the module's else-branch.
    outputs_verb_class = jnp.zeros((L, B, Q, num_verb_classes), jnp.float32)

    out = {
        "pred_obj_logits": outputs_obj_class[-1],
        "pred_verb_logits": outputs_verb_class[-1],
        "pred_sub_boxes": outputs_sub_coord[-1],
        "pred_obj_boxes": outputs_obj_coord[-1],
        "binary_decoder_weight": binary_decoder_weight,
        "pred_binary_logits": pred_binary_logits[-1],
        "pred_part_binary_logits": jnp.transpose(pred_part_binary, (2, 0, 1, 3)),
        "mask_object": mask_object,
        "mask_human": mask_human,
    }
    return out


# ----------------------------------------------------------------------------
if __name__ == "__main__":
    B, H, W, C_in = 2, 16, 16, 4          # feature map from the (stubbed) backbone
    hidden_dim = 32
    num_queries = 8
    num_obj_classes = 11                  # -> 12 logits
    num_verb_classes = 5

    key = jax.random.PRNGKey(0)
    k_src, k_params = jax.random.split(key)

    # Backbone is external; its (stubbed) output is produced channels-last
    # so no layout transpose is needed anywhere in the forward.
    src = jax.random.normal(k_src, (B, H, W, C_in), jnp.float32)       # NHWC
    mask = jnp.zeros((B, H, W), jnp.bool_)                             # padding mask
    img_size = jnp.array([[512.0, 512.0], [512.0, 512.0]], jnp.float32)  # (H, W)

    params = init_params(k_params, C_in, hidden_dim, num_obj_classes, num_queries)
    packed_heads = pack_head_params(params)        # hoisted: runs once at init
    jax.block_until_ready(packed_heads)

    out = detr_partmap_forward(params, packed_heads, src, mask, img_size,
                               num_verb_classes=num_verb_classes)
    jax.block_until_ready(out)

    assert out["pred_obj_logits"].shape == (B, num_queries, num_obj_classes + 1)
    assert out["pred_obj_boxes"].shape == (B, num_queries, 4)
    assert out["pred_sub_boxes"].shape == (B, num_queries, 4)
    assert out["pred_binary_logits"].shape == (B, num_queries, 2)
    assert out["mask_object"].shape == (B, num_queries, H, W)
    assert out["mask_human"].shape == (B, num_queries, H, W)
    print("KERNEL_OK")
</pallas_src>

<mosaic_0001>
module attributes {stable_mosaic.version = 11 : i64} {
  func.func @kernel(%arg0: i32, %arg1: i32, %arg2: memref<8x128xf32, #tpu.memory_space<vmem>>, %arg3: memref<128x128xf32, #tpu.memory_space<vmem>>, %arg4: memref<1x128xf32, #tpu.memory_space<vmem>>, %arg5: memref<1x1x128xf32, #tpu.memory_space<vmem>>, %arg6: memref<1x128xf32, #tpu.memory_space<vmem>>) attributes {dimension_semantics = [#tpu.dimension_semantics<parallel>, #tpu.dimension_semantics<arbitrary>], iteration_bounds = array<i64: 2, 1>, scalar_prefetch = 0 : i64, scratch_operands = 1 : i64, tpu.core_type = #tpu.core_type<tc>, window_params = [{transform_indices = @transform_0, window_bounds = array<i64: 8, 128>}, {pipeline_mode = #tpu.pipeline_mode<synchronous>, transform_indices = @transform_1, window_bounds = array<i64: 128, 128>}, {pipeline_mode = #tpu.pipeline_mode<synchronous>, transform_indices = @transform_2, window_bounds = array<i64: 1, 128>}, {transform_indices = @transform_3, window_bounds = array<i64: 1, 1, 128>}]} {
    %c0_i32 = arith.constant 0 : i32
    %0 = arith.cmpi eq, %arg1, %c0_i32 : i32
    %1 = arith.extui %0 : i1 to i32
    %c0_i32_0 = arith.constant 0 : i32
    %2 = arith.cmpi ne, %1, %c0_i32_0 : i32
    scf.if %2 {
      %cst_8 = arith.constant 0.000000e+00 : f32
      %12 = vector.broadcast %cst_8 : f32 to vector<1x128xf32>
      %c0_9 = arith.constant 0 : index
      %c0_10 = arith.constant 0 : index
      %13 = vector.load %arg6[%c0_9, %c0_10] : memref<1x128xf32, #tpu.memory_space<vmem>>, vector<1x128xf32>
      tpu.vector_store %arg6[%c0_9, %c0_10], %12 {strides = array<i32>} : memref<1x128xf32, #tpu.memory_space<vmem>>, vector<1x128xf32>,
    } else {
    }
    %c0 = arith.constant 0 : index
    %c0_1 = arith.constant 0 : index
    %3 = vector.load %arg6[%c0, %c0_1] : memref<1x128xf32, #tpu.memory_space<vmem>>, vector<1x128xf32>
    %c0_2 = arith.constant 0 : index
    %c0_3 = arith.constant 0 : index
    %4 = vector.load %arg2[%c0_2, %c0_3] : memref<8x128xf32, #tpu.memory_space<vmem>>, vector<8x128xf32>
    %cst = arith.constant dense<0.000000e+00> : vector<128xf32>
    %5 = vector.multi_reduction <add>, %4, %cst [0] : vector<8x128xf32> to vector<128xf32>
    %6 = vector.shape_cast %5 : vector<128xf32> to vector<1x128xf32>
    %7 = arith.addf %3, %6 : vector<1x128xf32>
    %c0_4 = arith.constant 0 : index
    %c0_5 = arith.constant 0 : index
    %8 = vector.load %arg6[%c0_4, %c0_5] : memref<1x128xf32, #tpu.memory_space<vmem>>, vector<1x128xf32>
    tpu.vector_store %arg6[%c0_4, %c0_5], %7 {strides = array<i32>} : memref<1x128xf32, #tpu.memory_space<vmem>>, vector<1x128xf32>,
    %c0_i32_6 = arith.constant 0 : i32
    %9 = arith.cmpi eq, %arg1, %c0_i32_6 : i32
    %10 = arith.extui %9 : i1 to i32
    %c0_i32_7 = arith.constant 0 : i32
    %11 = arith.cmpi ne, %10, %c0_i32_7 : i32
    scf.if %11 {
      %c0_8 = arith.constant 0 : index
      %c0_9 = arith.constant 0 : index
      %12 = vector.load %arg6[%c0_8, %c0_9] : memref<1x128xf32, #tpu.memory_space<vmem>>, vector<1x128xf32>
      %cst_10 = arith.constant 3.906250e-03 : f32
      %13 = vector.broadcast %cst_10 : f32 to vector<1x128xf32>
      %14 = arith.mulf %12, %13 : vector<1x128xf32>
      %c0_11 = arith.constant 0 : index
      %c0_12 = arith.constant 0 : index
      %15 = vector.load %arg3[%c0_11, %c0_12] : memref<128x128xf32, #tpu.memory_space<vmem>>, vector<128x128xf32>
      %cst_13 = arith.constant dense<0.000000e+00> : vector<1x128xf32>
      %16 = tpu.matmul %14, %15, %cst_13 {dimension_numbers = #tpu.dot_dimension_numbers<[1], [0], [0], [1], [0, 0, 1, 1], [], []>} : vector<1x128xf32>, vector<128x128xf32>, vector<1x128xf32> -> vector<1x128xf32>
      %c0_14 = arith.constant 0 : index
      %c0_15 = arith.constant 0 : index
      %17 = vector.load %arg4[%c0_14, %c0_15] : memref<1x128xf32, #tpu.memory_space<vmem>>, vector<1x128xf32>
      %18 = arith.addf %16, %17 : vector<1x128xf32>
      %19 = vector.shape_cast %18 : vector<1x128xf32> to vector<1x1x128xf32>
      %c0_16 = arith.constant 0 : index
      %c0_17 = arith.constant 0 : index
      %c0_18 = arith.constant 0 : index
      %20 = vector.load %arg5[%c0_16, %c0_17, %c0_18] : memref<1x1x128xf32, #tpu.memory_space<vmem>>, vector<1x1x128xf32>
      tpu.vector_store %arg5[%c0_16, %c0_17, %c0_18], %19 {strides = array<i32>} : memref<1x1x128xf32, #tpu.memory_space<vmem>>, vector<1x1x128xf32>,
    } else {
    }
    return
  }
  func.func @transform_0(%arg0: i32, %arg1: i32) -> (i32, i32) {
    %c1_i32 = arith.constant 1 : i32
    %0 = arith.muli %arg0, %c1_i32 : i32
    %1 = arith.addi %0, %arg1 : i32
    %c0_i32 = arith.constant 0 : i32
    %c0_i32_0 = arith.constant 0 : i32
    return %1, %c0_i32 : i32, i32
  }
  func.func @transform_1(%arg0: i32, %arg1: i32) -> (i32, i32) {
    %c0_i32 = arith.constant 0 : i32
    %c0_i32_0 = arith.constant 0 : i32
    %c0_i32_1 = arith.constant 0 : i32
    return %c0_i32, %c0_i32_0 : i32, i32
  }
  func.func @transform_2(%arg0: i32, %arg1: i32) -> (i32, i32) {
    %c0_i32 = arith.constant 0 : i32
    %c0_i32_0 = arith.constant 0 : i32
    %c0_i32_1 = arith.constant 0 : i32
    return %c0_i32, %c0_i32_0 : i32, i32
  }
  func.func @transform_3(%arg0: i32, %arg1: i32) -> (i32, i32, i32) {
    %c0_i32 = arith.constant 0 : i32
    %c0_i32_0 = arith.constant 0 : i32
    %c0_i32_1 = arith.constant 0 : i32
    return %arg0, %c0_i32, %c0_i32_0 : i32, i32, i32
  }
}

</mosaic_0001>

<bundles_post_ra>
// kernel: tpu_custom_call.1
= control target key start
LH: loop header
LB: loop body
LE: loop exit
PB: predicated region body
PF: predicated region fallthrough
CT: control target
= control target key end

     0   :  { %8 = vsyncpa [#allocation4], 0  ;;  %s981_s0 = inlined_call_operand.hbm [shape: f32[16,128], index: 0, kind: input, shape index: {}]   ;;  %s982_s1 = inlined_call_operand.hbm [shape: f32[128,128], index: 1, kind: input, shape index: {}]   ;;  %s983_s2 = inlined_call_operand.vmem [shape: f32[1,128], index: 2, kind: input, shape index: {}]   ;;  %s984_s3 = inlined_call_operand.hbm [shape: f32[2,1,128], index: 3, kind: output, shape index: {}]  }
   0x1   :  { %10 = vsyncpa [#allocation4 + $0x1], 0 }
   0x2   :  { %11 = vsyncpa [#allocation7], 0 }
   0x3   :  { %12 = vsyncpa [#allocation5], 0 }
   0x4   :  { %14 = vsyncpa [#allocation5 + $0x1], 0  ;;  %s763_s12 = smov 0   ;;  %s765_s13 = smov 0  }
   0x5   :  { %s767_s14 = smov 0   ;;  %s769_s15 = smov 0  }
   0x6   :  { %s771_s16 = smov 0   ;;  %s773_s17 = smov 0  }
   0x7 LB: > { %s422_s18 = sadd.s32 4294967295, %s733_s17   ;;  %s423_s19 = sadd.s32 4294967294, %s733_s17   ;;  %s733_s17 = sphi %s773_s17, %s20_s17   ;;  %s729_s16 = sphi %s771_s16, %s1008_s16   ;;  %s725_s15 = sphi %s769_s15, %s1007_s15   ;;  %s721_s14 = sphi %s767_s14, %s1006_s14   ;;  %s717_s13 = sphi %s765_s13, %s1005_s13   ;;  %s713_s12 = sphi %s763_s12, %s1004_s12  }
   0x8   : > { %p54_p0 = scmp.ne.s32.totalorder %s717_s13, %s713_s12  ;;  %p797_p1 = scmp.eq.s32.totalorder %s422_s18, 0 }
   0x9   : > { %p801_p2 = scmp.eq.s32.totalorder %s422_s18, 1  ;;  %p126_p3 = scmp.eq.s32.totalorder %s423_s19, 1 }
   0xa   : > { %s989_s20 = scalar_select %p797_p1, 1, 0 }
   0xb   : > { %s990_s21 = scalar_select %p801_p2, 1, 0 }
   0xc   : > { %p807_p4 = por %p797_p1, %p54_p0  ;;  %p424_p5 = scmp.ge.s32.totalorder %s733_s17, 1 }
   0xd   : > { %p812_p6 = por %p126_p3, %p54_p0  ;;  %p133_p7 = scmp.lt.s32.totalorder %s733_s17, 3 }
   0xe   : > { %s991_s22 = scalar_select %p807_p4, 1, 0 }
   0xf   : > { %s992_s23 = scalar_select %p812_p6, 1, 0 }
  0x10   : > { %p817_p8 = pnand %p424_p5, %p133_p7  ;;  %s735_s25 = smov [#allocation6]  }
  0x11   : > { %s145_s26 = sshll.u32 %s735_s25, 4  ;;  %s32_s28 = sadd.s32 1, %s729_s16  ;;  %s146_s26 = int_to_ptr.vmem [resolvable:$true] %s145_s26 }
  0x12   : > { %s993_s24 = scalar_select %p817_p8, 1, 0 }
  0x13   : > { %p519_p9 = pneg %p817_p8  ;;  %s589_s4 = scalar_lea.hbm %s982_s1, 2048 }
  0x14   : > { %p590_p12 = scmp.ne.s32.totalorder %s982_s1, %s589_s4  ;;  %p596_p5 = scmp.lt.u32.totalorder %s589_s4, %s982_s1 }
  0x15   : > { %p826_p11 = pnand %p519_p9, %p797_p1 }
  0x17   : > { %p591_p13 = pneg %p826_p11 }
  0x19   : > { %p592_p0 = pnand %p591_p13, %p590_p12 }
  0x1b   : > { %p593_p3 = pneg %p592_p0 }
  0x1d   : > { %p598_p7 = pnand %p596_p5, %p593_p3 }
  0x1f   : > { %601 = shalt.err (!%p598_p7)
}
  0x20   : > { %s602_s9 = scalar_lea.vmem %s146_s26, 2048  ;;  %p610_p1 = scmp.lt.s32.totalorder %s146_s26, %s146_s26 }
  0x21   : > { %p603_p9 = scmp.ne.s32.totalorder %s146_s26, %s602_s9  ;;  %p611_p4 = scmp.lt.s32.totalorder %s602_s9, %s602_s9 }
  0x23   : > { %p605_p10 = pnand %p603_p9, %p591_p13  ;;  %p612_p8 = por %p611_p4, %p610_p1 }
  0x25   : > { %p606_p6 = pneg %p605_p10 }
  0x27   : > { %p613_p2 = pnand %p612_p8, %p606_p6 }
  0x29   : > { %616 = shalt.err (!%p613_p2)
}
  0x2a   : > { %s736_s10 = smov 128   ;;  %s737_s11 = smov 8  }
  0x2b   : > { %522 = dma.hbm_to_vmem [thread:$0]  (!%p826_p11), %s982_s1, 2048, %s146_s26, [#allocation7], %s736_s10, %s736_s10, %s737_s11  }
  0x2c   : > { %p34_p1 = scmp.ge.s32.totalorder %s32_s28, 2  ;;  %s41_s25 = sadd.s32 1, %s721_s14 }
  0x2d   : > { %p48_p2 = scmp.ne.s32.totalorder %s721_s14, %s717_s13  ;;  %p49_p4 = scmp.eq.s32.totalorder %s733_s17, 0 }
  0x2e   : > { %s1010_s28 = smov (%p34_p1, %s32_s28), 0  ;;  %p996_p8 = scmp.ne.s32.totalorder %s990_s21, 0 }
  0x2f   : > { %p853_p6 = por %p49_p4, %p48_p2  ;;  %s38_s27 = ssub.s32 %s729_s16, %s1010_s28 }
  0x30   : > { %p859_p10 = por %p996_p8, %p48_p2  ;;  %p532_p12 = scmp.lt.s32.totalorder %s733_s17, 2 }
  0x31   : > { %p39_p11 = scmp.eq.s32.totalorder %s38_s27, 0  ;;  %s162_s26 = sand.u32 1, %s721_s14  }
  0x32   : > { %s427_s4 = sshll.u32 %s162_s26, 3  ;;  %s428_s6 = sshll.u32 %s729_s16, 7 }
  0x33   : > { %s868_s5 = scalar_select %p39_p11, %s721_s14, %s41_s25  }
  0x34   : > { %s874_s9 = scalar_lea.hbm %s981_s0, %s428_s6  ;;  %s166_s21 = scalar_lea.vmem [#allocation3], %s427_s4 }
  0x35   : > { %s174_s10 = sshll.u32 %s166_s21, 4  ;;  %p880_p13 = pnand %p532_p12, %p853_p6  ;;  %s876_s10 = int_to_ptr.vmem [resolvable:$true] %s174_s10 }
  0x36   : > { %s163_s18 = scalar_lea.sflag [#allocation4], %s162_s26  ;;  %s617_s19 = scalar_lea.hbm %s874_s9, 128 }
  0x37   : > { %p618_p0 = scmp.ne.s32.totalorder %s874_s9, %s617_s19  ;;  %p619_p3 = pneg %p880_p13 }
  0x38   : > { %s622_s4 = scalar_lea.hbm %s981_s0, 256  ;;  %p623_p9 = scmp.lt.u32.totalorder %s874_s9, %s981_s0 }
  0x39   : > { %p620_p5 = pnand %p619_p3, %p618_p0  ;;  %p624_p1 = scmp.lt.u32.totalorder %s622_s4, %s617_s19 }
  0x3a   : > { %p626_p4 = scmp.lt.u32.totalorder %s617_s19, %s874_s9 }
  0x3b   : > { %p621_p7 = pneg %p620_p5  ;;  %p625_p2 = por %p624_p1, %p623_p9 }
  0x3d   : > { %p627_p6 = por %p626_p4, %p625_p2 }
  0x3f   : > { %p628_p8 = pnand %p627_p6, %p621_p7 }
  0x41   : > { %631 = shalt.err (!%p628_p8)
}
  0x42   : > { %s632_s26 = scalar_lea.vmem %s876_s10, 128  ;;  %s738_s7 = smov [#allocation3]  }
  0x43   : > { %p633_p12 = scmp.ne.s32.totalorder %s876_s10, %s632_s26  ;;  %s637_s8 = sshll.u32 %s738_s7, 4  ;;  %s638_s8 = int_to_ptr.vmem [resolvable:$false] %s637_s8 }
  0x44   : > { %s639_s21 = scalar_lea.vmem %s638_s8, 256  ;;  %p640_p5 = scmp.lt.s32.totalorder %s876_s10, %s638_s8 }
  0x45   : > { %p635_p11 = pnand %p633_p12, %p619_p3  ;;  %p641_p9 = scmp.lt.s32.totalorder %s639_s21, %s632_s26 }
  0x47   : > { %p636_p0 = pneg %p635_p11  ;;  %p642_p1 = por %p641_p9, %p640_p5 }
  0x49   : > { %p643_p2 = pnand %p642_p1, %p636_p0 }
  0x4b   : > { %646 = shalt.err (!%p643_p2)
}
  0x4c   : > { %526 = dma.hbm_to_vmem [thread:$0]  (!%p880_p13), %s874_s9, 128, %s876_s10, %s163_s18  }
  0x4d   : > { %p999_p7 = scmp.ne.s32.totalorder %s993_s24, 0 }
  0x4e   : > { %s912_s19 = sand.u32 (!%p999_p7), 1, %s717_s13   ;;  %p1000_p3 = scmp.ne.s32.totalorder (!%p999_p7), %s991_s22, 0 }
  0x4f   : > { %183 = sbr.rel (%p999_p7) target bundleno = 353 (0x161), region = 32  ;;  %s430_s25 = sshll.u32 (!%p999_p7), %s912_s19, 3 }
  0x50   : > { %s186_s27 = scalar_lea.sflag (!%p999_p7), [#allocation4], %s912_s19  ;;  %s189_s4 = scalar_lea.vmem (!%p999_p7), [#allocation3], %s430_s25 }
  0x56   : > { %700 = dma.done.wait (%p1000_p3), %s186_s27, 128  }
  0x57   : > { %702 = vsyncadd (%p1000_p3), %s186_s27, 4294967168  ;;  %p1001_p4 = scmp.ne.s32.totalorder %s989_s20, 0 }
  0x59   : > { %704 = dma.done.wait (%p1001_p4), [#allocation7], 2048  }
  0x5a   : > { %706 = vsyncadd (%p1001_p4), [#allocation7], 4294965248  ;;  %v739_v0 = vmov 0.0|0.0   ;;  %v740_v1 = vmov 0.0   ;;  %vm741_vm0 = vmmov 0   ;;  %v236_v2 = vld [vmem:[#allocation6] sm:$0xff] }
  0x5b   : > { %487 = vmatprep.subr.bf16.mxu0 %v739_v0  ;;  %220 = vst [vmem:[#allocation2] sm:$0x1] %v740_v1  ;;  %484 = vmatprep.mubr.msk.f32.mxu0 %vm741_vm0, %v740_v1  ;;  %v237_v3 = vld [vmem:[#allocation6 + $0x8] sm:$0xff]  ;;  %v238_v4 = vld [vmem:[#allocation6 + $0x10] sm:$0xff]  ;;  %v239_v6 = vld [vmem:[#allocation6 + $0x18] sm:$0xff]  ;;  %s432_s24 = sshll.u32 %s725_s15, 4 }
  0x5c   : > { %v488_v5 = vpack.c.bf16 %v237_v3, %v236_v2  ;;  %v491_v7 = vpack.c.bf16 %v239_v6, %v238_v4  ;;  %v240_v8 = vld [vmem:[#allocation6 + $0x20] sm:$0xff]  ;;  %v241_v9 = vld [vmem:[#allocation6 + $0x28] sm:$0xff]  ;;  %v222_v10 = vld [vmem:[%s189_s4] sm:$0xff]  ;;  %s214_s9 = scalar_lea.vmem [#allocation8], %s912_s19  ;;  %s932_s29 = scalar_lea.hbm %s984_s3, %s432_s24 }
  0x5d   : > { %v223_v11 = vrot.slane %v222_v10, 4  ;;  %v494_v12 = vpack.c.bf16 %v241_v9, %v240_v8  ;;  %v242_v13 = vld [vmem:[#allocation6 + $0x30] sm:$0xff]  ;;  %v243_v14 = vld [vmem:[#allocation6 + $0x38] sm:$0xff]  ;;  %v244_v18 = vld [vmem:[#allocation6 + $0x40] sm:$0xff]  ;;  %s337_s10 = sshll.u32 %s214_s9, 4  ;;  %s325_s6 = scalar_lea.sflag [#allocation5], %s912_s19  ;;  %s934_s10 = int_to_ptr.vmem [resolvable:$true] %s337_s10 }
  0x5e   : > { %489 = vmatpush3.bf16.msra.mxu0 %v488_v5  ;;  %v497_v17 = vpack.c.bf16 %v243_v14, %v242_v13  ;;  %v245_v19 = vld [vmem:[#allocation6 + $0x48] sm:$0xff]  ;;  %v246_v24 = vld [vmem:[#allocation6 + $0x50] sm:$0xff]  ;;  %v247_v25 = vld [vmem:[#allocation6 + $0x58] sm:$0xff]  ;;  %s647_s26 = scalar_lea.vmem %s934_s10, 16  ;;  %s742_s15 = smov [#allocation8]  }
  0x5f   : > { %490 = vmatprep.subr.bf16.mxu0 %v739_v0  ;;  %v224_v15 = vadd.f32 %v223_v11, %v222_v10  ;;  %v500_v22 = vpack.c.bf16 %v245_v19, %v244_v18  ;;  %v503_v28 = vpack.c.bf16 %v247_v25, %v246_v24  ;;  %v248_v29 = vld [vmem:[#allocation6 + $0x60] sm:$0xff]  ;;  %v249_v30 = vld [vmem:[#allocation6 + $0x68] sm:$0xff]  ;;  %v250_v32 = vld [vmem:[#allocation6 + $0x70] sm:$0xff]  ;;  %p648_p13 = scmp.ne.s32.totalorder %s934_s10, %s647_s26  ;;  %s651_s7 = sshll.u32 %s742_s15, 4  ;;  %s652_s7 = int_to_ptr.vmem [resolvable:$false] %s651_s7 }
  0x60   : > { %v506_v31 = vpack.c.bf16 %v249_v30, %v248_v29  ;;  %v251_v33 = vld [vmem:[#allocation6 + $0x78] sm:$0xff]  ;;  %v252_v37 = vld [vmem:[%s983_s2] sm:$0x1]  ;;  %s653_s8 = scalar_lea.vmem %s652_s7, 32  ;;  %p654_p12 = scmp.lt.s32.totalorder %s934_s10, %s652_s7 }
  0x61   : > { %v225_v16 = vrot.slane %v224_v15, 2  ;;  %v509_v34 = vpack.c.bf16 %v251_v33, %v250_v32  ;;  %p649_p6 = pnand %p648_p13, %p859_p10  ;;  %p655_p11 = scmp.lt.s32.totalorder %s653_s8, %s647_s26 }
  0x62   : > { %492 = vmatpush3.bf16.msra.mxu0 %v491_v7  ;;  %v221_v23 = vld [vmem:[#allocation2] sm:$0x1] }
  0x63   : > { %493 = vmatprep.subr.bf16.mxu0 %v739_v0  ;;  %v226_v20 = vadd.f32 %v225_v16, %v224_v15  ;;  %p650_p8 = pneg %p649_p6  ;;  %p656_p0 = por %p655_p11, %p654_p12 }
  0x65   : > { %v227_v21 = vrot.slane %v226_v20, 1  ;;  %p657_p5 = pnand %p656_p0, %p650_p8 }
  0x66   : > { %495 = vmatpush3.bf16.msra.mxu0 %v494_v12 }
  0x67   : > { %496 = vmatprep.subr.bf16.mxu0 %v739_v0  ;;  %v228_v26 = vadd.f32 %v227_v21, %v226_v20 }
  0x69   : > { %v229_v27 = vadd.f32 %v228_v26, %v221_v23 }
  0x6a   : > { %498 = vmatpush3.bf16.msra.mxu0 %v497_v17 }
  0x6b   : > { %499 = vmatprep.subr.bf16.mxu0 %v739_v0  ;;  %230 = vst [vmem:[#allocation2] sm:$0x1] %v229_v27 }
  0x6e   : > { %501 = vmatpush3.bf16.msra.mxu0 %v500_v22 }
  0x6f   : > { %502 = vmatprep.subr.bf16.mxu0 %v739_v0 }
  0x72   : > { %504 = vmatpush3.bf16.msra.mxu0 %v503_v28  ;;  %v234_v35 = vld [vmem:[#allocation2] sm:$0x1] }
  0x73   : > { %505 = vmatprep.subr.bf16.mxu0 %v739_v0  ;;  %v235_v36 = vmul.f32 0.00390625, %v234_v35 }
  0x76   : > { %507 = vmatpush3.bf16.msra.mxu0 %v506_v31 }
  0x77   : > { %508 = vmatprep.subr.bf16.mxu0 %v739_v0 }
  0x7a   : > { %510 = vmatpush3.bf16.msra.mxu0 %v509_v34 }
  0x7d   : > { %485 = vmatmul.mubr.f32.vlgmr.msra.gmra.mrb[0].mxu0 %v235_v36 }
 0x150   : > { %v319_v38 = vpop.f32.mrb[0].mxu0 }
 0x151   : > { %v320_v39 = vadd.f32 %v319_v38, %v252_v37  ;;  %v486_v40 = vpop.f32.mrb[1].mxu0 }
 0x153   : > { %323 = vst [vmem:[%s214_s9] sm:$0x1] %v320_v39 }
 0x154   : > { %660 = shalt.err (!%p657_p5)
}
 0x155   : > { %s661_s21 = scalar_lea.hbm %s932_s29, 16  ;;  %s665_s27 = scalar_lea.hbm %s984_s3, 32 }
 0x156   : > { %p662_p9 = scmp.ne.s32.totalorder %s932_s29, %s661_s21  ;;  %p666_p7 = scmp.lt.u32.totalorder %s932_s29, %s984_s3 }
 0x157   : > { %p667_p3 = scmp.lt.u32.totalorder %s665_s27, %s661_s21  ;;  %p669_p13 = scmp.lt.u32.totalorder %s661_s21, %s932_s29 }
 0x158   : > { %p663_p1 = pnand %p662_p9, %p859_p10 }
 0x159   : > { %p668_p4 = por %p667_p3, %p666_p7 }
 0x15a   : > { %p664_p2 = pneg %p663_p1 }
 0x15b   : > { %p670_p6 = por %p669_p13, %p668_p4 }
 0x15d   : > { %p671_p8 = pnand %p670_p6, %p664_p2 }
 0x15f   : > { %674 = shalt.err (!%p671_p8)
}
 0x160   : > { %517 = dma.vmem_to_hbm [thread:$0]  (%p859_p10), %s934_s10, 16, %s932_s29, %s325_s6  }
 0x161 PF: > { %s349_s22 = sand.u32 1, %s713_s12   ;;  %p1002_p12 = scmp.ne.s32.totalorder %s992_s23, 0 }
 0x162   : > { %p1003_p11 = scmp.ge.s32.totalorder %s733_s17, 2  ;;  %s350_s24 = scalar_lea.sflag [#allocation5], %s349_s22 }
 0x164   : > { %p528_p0 = pnand %p1003_p11, %p1002_p12 }
 0x166   : > { %708 = dma.done.wait (!%p528_p0), %s350_s24, 16  }
 0x167   : > { %710 = vsyncadd (!%p528_p0), %s350_s24, 4294967280  ;;  %s20_s17 = sadd.s32 1, %s733_s17   ;;  %s1004_s12 = smov %s717_s13 }
 0x168   : > { %p17_p5 = scmp.ge.s32.totalorder %s20_s17, 4   ;;  %s1005_s13 = smov %s721_s14 }
 0x169   : > { %s1006_s14 = smov %s868_s5  ;;  %s1007_s15 = smov %s729_s16 }
 0x16a   : > { %s1008_s16 = smov %s1010_s28  ;;  %19 = sbr.rel (!%p17_p5) target bundleno = 7 (0x7), region = 89 }
 0x171   :  { %354 = vsyncpa [#allocation4], 1 }
 0x172   :  { %356 = vsyncpa [#allocation4 + $0x1], 1 }
 0x173   :  { %357 = vsyncpa [#allocation7], 1 }
 0x174   :  { %358 = vsyncpa [#allocation5], 1 }
 0x175   :  { %360 = vsyncpa [#allocation5 + $0x1], 1 }

</bundles_post_ra>
